<compile_context>
chip_gen: v7x
topology: tpu7x:2x2x1
jax: 0.10.0
libtpu: 0.0.40
codegen_flags: <defaults>
</compile_context>

<pallas_src>
import jax
import jax.numpy as jnp
from jax.experimental import pallas as pl
from jax.experimental.pallas import tpu as pltpu


_VMEM_BUDGET_BYTES = 12 * 1024 * 1024   # fits v5e's 16 MiB scoped default w/ headroom
_TINY_ELEMENTS = 64 * 1024              # below this, plain XLA beats a pallas_call


# --------------------------------------------------------------------------
# Kernels
# --------------------------------------------------------------------------
def _kernel_bn(x_ref, w_ref, b_ref, out_ref):
    # out[bm, bn] = x[bm, K] @ W[K, bn] + b[1, bn]      (N on the lane axis)
    y = jnp.dot(x_ref[...], w_ref[...], preferred_element_type=jnp.float32)
    out_ref[...] = (y + b_ref[...]).astype(out_ref.dtype)


def _kernel_nb(w_ref, xt_ref, b_ref, out_ref):
    # out[bn, bm] = W[bn, K] @ x^T[K, bm] + b[bn, 1]    (batch on the lane axis)
    y = jnp.dot(w_ref[...], xt_ref[...], preferred_element_type=jnp.float32)
    out_ref[...] = (y + b_ref[...]).astype(out_ref.dtype)


# --------------------------------------------------------------------------
# Weight preparation (hoist out of the hot path; cache per parameter update)
# --------------------------------------------------------------------------
def prepare_consequent_weights(coeff):
    """One-time relayout of the (d_rule, d_out, d_in+1) parameter.

    Row / column index n = o * d_rule + r, matching the final
    (batch, d_out, d_rule) reshape.  Cache the result at parameter-update time
    so the forward pass never pays an extra HBM pass over coeff.
    """
    d_rule, d_out, k = coeff.shape
    n = d_rule * d_out
    w_nk = jnp.transpose(coeff, (1, 0, 2)).reshape(n, k)   # (N, d_in+1)
    w_kn = jnp.transpose(coeff, (2, 1, 0)).reshape(k, n)   # (d_in+1, N)
    return {
        "d_rule": d_rule, "d_out": d_out, "d_in": k - 1, "N": n,
        "w_kn": w_kn[:-1, :],    # (d_in, N)  standard-layout weight
        "b_1n": w_kn[-1:, :],    # (1, N)     standard-layout bias
        "w_nk": w_nk[:, :-1],    # (N, d_in)  transposed-layout weight
        "b_n1": w_nk[:, -1:],    # (N, 1)     transposed-layout bias
    }


# --------------------------------------------------------------------------
# Tile selection under a per-generation-safe VMEM budget
# --------------------------------------------------------------------------
def _footprint_bytes(rows, cols, k):
    # double-buffered x / W / bias tiles + output tile, float32
    return 2 * 4 * (rows * k + k * cols + cols + rows * cols)


def _pick_tiles(rows, cols, k, row_tile=512, col_tile=512):
    br = rows if rows <= row_tile else row_tile
    bc = cols if cols <= col_tile else col_tile
    while _footprint_bytes(br, bc, k) > _VMEM_BUDGET_BYTES:
        # Only halve axes that are actually tiled (keeps 128 alignment).
        can_halve_c = (bc < cols) and bc > 128
        can_halve_r = (br < rows) and br > 128
        if can_halve_c and (bc >= br or not can_halve_r):
            bc //= 2
        elif can_halve_r:
            br //= 2
        else:
            return None, None   # needs a K grid axis; caller falls back
    return br, bc


# --------------------------------------------------------------------------
# Forward
# --------------------------------------------------------------------------
def consequent_forward(x, coeff=None, *, prepared=None, force_pallas=False,
                       m_tile=512, n_tile=512):
    """x: (batch, d_in); coeff: (d_rule, d_out, d_in+1) -> (batch, d_out, d_rule)."""
    assert (coeff is None) != (prepared is None), "pass exactly one of coeff / prepared"
    if prepared is None:
        prepared = prepare_consequent_weights(coeff)

    batch, d_in = x.shape
    assert prepared["d_in"] == d_in, (prepared["d_in"], d_in)
    d_rule, d_out, N = prepared["d_rule"], prepared["d_out"], prepared["N"]

    def _xla_path():
        y2d = x @ prepared["w_kn"] + prepared["b_1n"]
        return y2d.reshape(batch, d_out, d_rule)

    # Tiny problems: pallas_call fixed overhead dominates -> fused XLA GEMM.
    if not force_pallas and batch * N < _TINY_ELEMENTS:
        return _xla_path()

    cost = pl.CostEstimate(
        flops=2 * batch * d_in * N,
        transcendentals=0,
        bytes_accessed=4 * (batch * d_in + d_in * N + N + batch * N),
    )
    cparams = pltpu.CompilerParams(dimension_semantics=("parallel", "parallel"))

    use_transposed = (N < 128) and (batch >= 128)

    if use_transposed:
        # --- Lane-dense transposed layout: output (N, batch) ------------------
        w_nk, b_n1 = prepared["w_nk"], prepared["b_n1"]
        bn, bm = _pick_tiles(N, batch, d_in, m_tile, n_tile)
        if bn is None:
            # TODO(synk): add a K grid axis with a f32 VMEM accumulator for very
            # large d_in instead of falling back to XLA.
            return _xla_path()
        xt = x.T                                    # (d_in, batch): layout plumbing
        grid = (pl.cdiv(N, bn), pl.cdiv(batch, bm))  # N outer -> each W tile DMA'd once
        y_nb = pl.pallas_call(
            _kernel_nb,
            out_shape=jax.ShapeDtypeStruct((N, batch), x.dtype),
            grid=grid,
            in_specs=[
                pl.BlockSpec((bn, d_in), lambda j, i: (j, 0)),   # W (resident per j)
                pl.BlockSpec((d_in, bm), lambda j, i: (0, i)),   # x^T (re-streamed, tiny)
                pl.BlockSpec((bn, 1), lambda j, i: (j, 0)),      # bias
            ],
            out_specs=pl.BlockSpec((bn, bm), lambda j, i: (j, i)),
            compiler_params=cparams,
            cost_estimate=cost,
        )(w_nk, xt, b_n1)
        # (N, batch) -> (d_out, d_rule, batch) -> (batch, d_out, d_rule)
        return jnp.transpose(y_nb.reshape(d_out, d_rule, batch), (2, 0, 1))

    # --- Standard layout: output (batch, N), N on lanes --------------------------
    w_kn, b_1n = prepared["w_kn"], prepared["b_1n"]
    bm, bn = _pick_tiles(batch, N, d_in, m_tile, n_tile)
    if bm is None:
        # TODO(synk): add a K grid axis with a f32 VMEM accumulator for very
        # large d_in instead of falling back to XLA.
        return _xla_path()
    grid = (pl.cdiv(N, bn), pl.cdiv(batch, bm))      # N outer -> each W tile DMA'd once
    y2d = pl.pallas_call(
        _kernel_bn,
        out_shape=jax.ShapeDtypeStruct((batch, N), x.dtype),
        grid=grid,
        in_specs=[
            pl.BlockSpec((bm, d_in), lambda j, i: (i, 0)),       # x (re-streamed, tiny)
            pl.BlockSpec((d_in, bn), lambda j, i: (0, j)),       # W (resident per j)
            pl.BlockSpec((1, bn), lambda j, i: (0, j)),          # bias
        ],
        out_specs=pl.BlockSpec((bm, bn), lambda j, i: (i, j)),
        compiler_params=cparams,
        cost_estimate=cost,
    )(x, w_kn, b_1n)
    # Pure view: (batch, d_out*d_rule) -> (batch, d_out, d_rule)
    return y2d.reshape(batch, d_out, d_rule)


# --------------------------------------------------------------------------
# Self-test
# --------------------------------------------------------------------------
if __name__ == "__main__":
    key = jax.random.PRNGKey(0)

    def ref_forward(x, coeff):
        # Exact torch semantics in pure JAX.
        x_plus = jnp.concatenate([x, jnp.ones((x.shape[0], 1), x.dtype)], axis=1)
        y = jnp.einsum("rok,bk->rob", coeff, x_plus)        # (d_rule, d_out, batch)
        return jnp.transpose(y, (2, 1, 0))                   # (batch, d_out, d_rule)

    # (batch, d_in, d_rule, d_out)
    cases = [
        (2, 4, 8, 3),       # module-default tiny case, standard (batch, N) layout
        (256, 16, 12, 5),   # N=60 < 128, batch >= 128 -> lane-dense transposed layout
        (64, 8, 32, 8),     # N=256 >= 128 -> standard layout, lane-dense N
    ]

    for (batch, d_in, d_rule, d_out) in cases:
        key, kx, kc = jax.random.split(key, 3)
        x = jax.random.normal(kx, (batch, d_in), dtype=jnp.float32)
        # The PyTorch module initialises coeff to zeros; use random values here
        # so the kernel computes something non-trivial.
        coeff = jax.random.normal(kc, (d_rule, d_out, d_in + 1), dtype=jnp.float32)

        out = consequent_forward(x, coeff, force_pallas=True)
        out = jax.block_until_ready(out)
        ref = ref_forward(x, coeff)

        assert out.shape == (batch, d_out, d_rule), out.shape
        assert jnp.allclose(out, ref, atol=1e-4, rtol=1e-4), (
            f"mismatch vs reference for case {(batch, d_in, d_rule, d_out)}")

    print("KERNEL_OK")
</pallas_src>

<mosaic_0001>
module attributes {stable_mosaic.version = 11 : i64} {
  func.func @_kernel_bn(%arg0: i32, %arg1: i32, %arg2: memref<2x4xf32, #tpu.memory_space<vmem>>, %arg3: memref<4x24xf32, #tpu.memory_space<vmem>>, %arg4: memref<1x24xf32, #tpu.memory_space<vmem>>, %arg5: memref<2x24xf32, #tpu.memory_space<vmem>>) attributes {dimension_semantics = [#tpu.dimension_semantics<parallel>, #tpu.dimension_semantics<parallel>], iteration_bounds = array<i64: 1, 1>, scalar_prefetch = 0 : i64, scratch_operands = 0 : i64, tpu.core_type = #tpu.core_type<tc>, window_params = [{transform_indices = @transform_0, window_bounds = array<i64: 2, 4>}, {transform_indices = @transform_1, window_bounds = array<i64: 4, 24>}, {transform_indices = @transform_2, window_bounds = array<i64: 1, 24>}, {transform_indices = @transform_3, window_bounds = array<i64: 2, 24>}]} {
    %c0 = arith.constant 0 : index
    %c0_0 = arith.constant 0 : index
    %0 = vector.load %arg2[%c0, %c0_0] : memref<2x4xf32, #tpu.memory_space<vmem>>, vector<2x4xf32>
    %c0_1 = arith.constant 0 : index
    %c0_2 = arith.constant 0 : index
    %1 = vector.load %arg3[%c0_1, %c0_2] : memref<4x24xf32, #tpu.memory_space<vmem>>, vector<4x24xf32>
    %cst = arith.constant dense<0.000000e+00> : vector<2x24xf32>
    %2 = tpu.matmul %0, %1, %cst {dimension_numbers = #tpu.dot_dimension_numbers<[1], [0], [0], [1], [0, 0, 1, 1], [], []>} : vector<2x4xf32>, vector<4x24xf32>, vector<2x24xf32> -> vector<2x24xf32>
    %c0_3 = arith.constant 0 : index
    %c0_4 = arith.constant 0 : index
    %3 = vector.load %arg4[%c0_3, %c0_4] : memref<1x24xf32, #tpu.memory_space<vmem>>, vector<1x24xf32>
    %4 = vector.broadcast %3 : vector<1x24xf32> to vector<2x24xf32>
    %5 = arith.addf %2, %4 : vector<2x24xf32>
    %c0_5 = arith.constant 0 : index
    %c0_6 = arith.constant 0 : index
    %6 = vector.load %arg5[%c0_5, %c0_6] : memref<2x24xf32, #tpu.memory_space<vmem>>, vector<2x24xf32>
    tpu.vector_store %arg5[%c0_5, %c0_6], %5 {strides = array<i32>} : memref<2x24xf32, #tpu.memory_space<vmem>>, vector<2x24xf32>,
    return
  }
  func.func @transform_0(%arg0: i32, %arg1: i32) -> (i32, i32) {
    %c0_i32 = arith.constant 0 : i32
    %c0_i32_0 = arith.constant 0 : i32
    return %arg1, %c0_i32 : i32, i32
  }
  func.func @transform_1(%arg0: i32, %arg1: i32) -> (i32, i32) {
    %c0_i32 = arith.constant 0 : i32
    %c0_i32_0 = arith.constant 0 : i32
    return %c0_i32, %arg0 : i32, i32
  }
  func.func @transform_2(%arg0: i32, %arg1: i32) -> (i32, i32) {
    %c0_i32 = arith.constant 0 : i32
    %c0_i32_0 = arith.constant 0 : i32
    return %c0_i32, %arg0 : i32, i32
  }
  func.func @transform_3(%arg0: i32, %arg1: i32) -> (i32, i32) {
    %c0_i32 = arith.constant 0 : i32
    return %arg1, %arg0 : i32, i32
  }
}

</mosaic_0001>

<bundles_post_ra>
// kernel: tpu_custom_call.1
= control target key start
LH: loop header
LB: loop body
LE: loop exit
PB: predicated region body
PF: predicated region fallthrough
CT: control target
= control target key end

     0   :  { %8 = vsyncpa [#allocation3], 0  ;;  %s295_s0 = inlined_call_operand.hbm [shape: f32[2,4], index: 0, kind: input, shape index: {}]   ;;  %s296_s1 = inlined_call_operand.hbm [shape: f32[4,24], index: 1, kind: input, shape index: {}]   ;;  %s297_s2 = inlined_call_operand.vmem [shape: f32[1,24], index: 2, kind: input, shape index: {}]   ;;  %s298_s3 = inlined_call_operand.hbm [shape: f32[2,24], index: 3, kind: output, shape index: {}]  }
   0x1   :  { %9 = vsyncpa [#allocation6], 0 }
   0x2   :  { %10 = vsyncpa [#allocation4], 0  ;;  %s231_s12 = smov [#allocation2]   ;;  %s232_s14 = smov [#allocation5]  }
   0x3   :  { %s17_s13 = sshll.u32 %s231_s12, 4  ;;  %s27_s15 = sshll.u32 %s232_s14, 4  ;;  %s18_s13 = int_to_ptr.vmem [resolvable:$true] %s17_s13  ;;  %s28_s15 = int_to_ptr.vmem [resolvable:$true] %s27_s15 }
   0x4   :  { %s159_s18 = scalar_lea.hbm %s295_s0, 32 }
   0x5   :  { %p160_p0 = scmp.ne.s32.totalorder %s295_s0, %s159_s18  ;;  %p163_p1 = scmp.lt.u32.totalorder %s159_s18, %s295_s0 }
   0x7   :  { %p165_p2 = pnand %p163_p1, %p160_p0 }
   0x9   :  { %168 = shalt.err (!%p165_p2)
}
   0xa   :  { %s169_s23 = scalar_lea.vmem %s18_s13, 32  ;;  %p174_p4 = scmp.lt.s32.totalorder %s18_s13, %s18_s13 }
   0xb   :  { %p170_p3 = scmp.ne.s32.totalorder %s18_s13, %s169_s23  ;;  %p175_p5 = scmp.lt.s32.totalorder %s169_s23, %s169_s23 }
   0xd   :  { %p176_p6 = por %p175_p5, %p174_p4 }
   0xf   :  { %p177_p7 = pnand %p176_p6, %p170_p3 }
  0x11   :  { %180 = shalt.err (!%p177_p7)
}
  0x12   :  { %20 = dma.hbm_to_vmem [thread:$0]  %s295_s0, 32, %s18_s13, [#allocation3]  }
  0x13   :  { %s181_s28 = scalar_lea.hbm %s296_s1, 64 }
  0x14   :  { %p182_p8 = scmp.ne.s32.totalorder %s296_s1, %s181_s28  ;;  %p185_p9 = scmp.lt.u32.totalorder %s181_s28, %s296_s1 }
  0x16   :  { %p187_p10 = pnand %p185_p9, %p182_p8 }
  0x18   :  { %190 = shalt.err (!%p187_p10)
}
  0x19   :  { %s191_s6 = scalar_lea.vmem %s28_s15, 64  ;;  %p196_p12 = scmp.lt.s32.totalorder %s28_s15, %s28_s15 }
  0x1a   :  { %p192_p11 = scmp.ne.s32.totalorder %s28_s15, %s191_s6  ;;  %p197_p13 = scmp.lt.s32.totalorder %s191_s6, %s191_s6 }
  0x1c   :  { %p198_p0 = por %p197_p13, %p196_p12 }
  0x1e   :  { %p199_p1 = pnand %p198_p0, %p192_p11 }
  0x20   :  { %202 = shalt.err (!%p199_p1)
}
  0x21   :  { %30 = dma.hbm_to_vmem [thread:$0]  %s296_s1, 64, %s28_s15, [#allocation6]  }
  0x22   :  { %225 = dma.done.wait [#allocation3], 32  }
  0x23   :  { %226 = vsyncadd [#allocation3], 4294967264 }
  0x24   :  { %227 = dma.done.wait [#allocation6], 64  }
  0x25   :  { %228 = vsyncadd [#allocation6], 4294967232  ;;  %v233_v0 = vmov 0.0   ;;  %vm234_vm0 = vmmov 0   ;;  %vm52_vm1 = vcmask 1043456   ;;  %vm48_vm2 = vcmask 31744  }
  0x26   :  { %149 = vmatprep.subr.mxu0 %v233_v0  ;;  %151 = vmatprep.mubr.msk.f32.mxu0 %vm234_vm0, %v233_v0  ;;  %v40_v1 = vld [vmem:[#allocation5] sm:$0xf]  ;;  %v39_v2 = vld [vmem:[#allocation2] sm:$0x3]  ;;  %s235_s10 = smov [#allocation7]   ;;  %vm126_vm3 = vcmask 189440  }
  0x27   :  { %150 = vmatpush3.msk.msra.mxu0 %vm52_vm1, %v40_v1  ;;  %v144_v3 = vld [vmem:[%s297_s2] ss:$0 sm:$0xff]  ;;  %s134_s1 = sshll.u32 %s235_s10, 4  ;;  %s135_s1 = int_to_ptr.vmem [resolvable:$true] %s134_s1 }
  0x28   :  { %152 = vmatmul.mubr.msk.f32.vlgmr.msra.gmra.mrb[0].mxu0 %vm48_vm2, %v39_v2  ;;  %s203_s11 = scalar_lea.vmem %s135_s1, 32  ;;  %p208_p3 = scmp.lt.s32.totalorder %s135_s1, %s135_s1 }
  0x29   :  { %p204_p2 = scmp.ne.s32.totalorder %s135_s1, %s203_s11  ;;  %p209_p4 = scmp.lt.s32.totalorder %s203_s11, %s203_s11 }
  0x2b   :  { %p210_p5 = por %p209_p4, %p208_p3 }
  0x2d   :  { %p211_p6 = pnand %p210_p5, %p204_p2 }
  0xfb   :  { %v122_v4 = vpop.f32.mrb[0].mxu0 }
  0xfc   :  { %v123_v5 = vadd.f32 %v144_v3, %v122_v4  ;;  %v153_v6 = vpop.f32.mrb[1].mxu0 }
  0xfe   :  { %127 = vst.msk [vmem:[#allocation7] sm:$0x3] %vm126_vm3, %v123_v5 }
  0xff   :  { %214 = shalt.err (!%p211_p6)
}
 0x100   :  { %s215_s14 = scalar_lea.hbm %s298_s3, 32 }
 0x101   :  { %p216_p7 = scmp.ne.s32.totalorder %s298_s3, %s215_s14  ;;  %p219_p8 = scmp.lt.u32.totalorder %s215_s14, %s298_s3 }
 0x103   :  { %p221_p9 = pnand %p219_p8, %p216_p7 }
 0x105   :  { %224 = shalt.err (!%p221_p9)
}
 0x106   :  { %137 = dma.vmem_to_hbm [thread:$0]  %s135_s1, 32, %s298_s3, [#allocation4]  }
 0x107   :  { %229 = dma.done.wait [#allocation4], 32  }
 0x108   :  { %230 = vsyncadd [#allocation4], 4294967264 }
 0x109   :  { %141 = vsyncpa [#allocation3], 1 }
 0x10a   :  { %142 = vsyncpa [#allocation6], 1 }
 0x10b   :  { %143 = vsyncpa [#allocation4], 1 }

</bundles_post_ra>
